<compile_context>
chip_gen: v7x
topology: tpu7x:2x2x1
jax: 0.10.0
libtpu: 0.0.40
codegen_flags: <defaults>
</compile_context>

<pallas_src>
import functools

import jax
import jax.numpy as jnp
from jax import lax
from jax.experimental import pallas as pl
from jax.experimental.pallas import tpu as pltpu

LANES = 128
SUBLANES = 8
CHUNK_ROWS = 256   # inner compute chunk: 256x128 f32 = 128 KiB per temporary


def _elementwise_qfocal(x, z, *, gamma, alpha):
    """Per-element QFocal loss, f32 in / f32 out (VPU + EUP only)."""
    # Shared exp(-|x|) for stable BCE-with-logits and sigmoid.
    e = jnp.exp(-jnp.abs(x))
    bce = jnp.maximum(x, 0.0) - x * z + jnp.log1p(e)
    den = 1.0 + e
    s = pl.reciprocal(den, approx=True)        # single EUP vrcp (~2^-12 rel err)
    s = s * (2.0 - den * s)                    # one Newton step -> ~f32 accuracy
    pred_prob = jnp.where(x >= 0.0, s, e * s)  # sigmoid(x)

    alpha_factor = z * alpha + (1.0 - z) * (1.0 - alpha)
    t = jnp.abs(z - pred_prob)                 # modulating base (>= 0)
    if gamma == 1.5:
        modulating = t * jnp.sqrt(t)
    elif gamma == 2.0:
        modulating = t * t
    elif gamma == 1.0:
        modulating = t
    elif gamma == 0.5:
        modulating = jnp.sqrt(t)
    elif gamma == 0.0:
        modulating = jnp.ones_like(t)
    else:
        modulating = jnp.power(t, gamma)       # generic fallback (+2 EUP ops/elem)
    return bce * alpha_factor * modulating


def _fold_to_partial(loss):
    """(r, 128) -> (8, 128) via pure VPU vreg adds (no cross-lane reduce)."""
    r = loss.shape[0]
    return loss.reshape(r // SUBLANES, SUBLANES, LANES).sum(axis=0)


def _qfocal_kernel(pred_ref, true_ref, partial_ref, *, gamma, alpha,
                   block_rows, chunk_rows, rows_total, masked_grid):
    nfull = block_rows // chunk_rows
    rem = block_rows - nfull * chunk_rows
    base_row = pl.program_id(0) * block_rows

    def chunk_partial(row0, r, mask):
        x = pred_ref[pl.ds(row0, r), :].astype(jnp.float32)
        z = true_ref[pl.ds(row0, r), :].astype(jnp.float32)
        loss = _elementwise_qfocal(x, z, gamma=gamma, alpha=alpha)
        if mask:
            # Validity is purely per-row (n_main is a multiple of 128), so a
            # (r, 1) row-index compare suffices.  NaN/Inf from garbage rows is
            # eliminated by the select before accumulation.
            local = lax.broadcasted_iota(jnp.int32, (r, 1), 0)
            valid = (base_row + row0 + local) < rows_total
            loss = jnp.where(valid, loss, 0.0)
        return _fold_to_partial(loss)

    def run(mask):
        if nfull == 1 and rem == 0:
            # Whole block is one static chunk.
            partial_ref[...] = chunk_partial(0, chunk_rows, mask)
            return
        acc = jnp.zeros((SUBLANES, LANES), jnp.float32)

        def body(c, a):
            row0 = pl.multiple_of(c * chunk_rows, chunk_rows)
            return a + chunk_partial(row0, chunk_rows, mask)

        acc = lax.fori_loop(0, nfull, body, acc)
        if rem:
            acc = acc + chunk_partial(nfull * chunk_rows, rem, mask)
        partial_ref[...] = acc

    if masked_grid:
        # Only the last block can contain rows past rows_total; every other
        # block runs the mask-free fast path.
        is_last = pl.program_id(0) == pl.num_programs(0) - 1

        @pl.when(is_last)
        def _():
            run(True)

        @pl.when(jnp.logical_not(is_last))
        def _():
            run(False)
    else:
        run(False)


def _round_down(x, m):
    return (x // m) * m


def _pick_max_block_rows():
    """Bigger blocks amortize per-step overhead; v5e gets smaller VMEM budget."""
    try:
        kind = jax.devices()[0].device_kind.lower()
    except Exception:
        kind = ""
    if "v5 lite" in kind or "v5e" in kind or "v5lite" in kind:
        return 4096   # 2x 2 MiB double-buffered f32 inputs = 8 MiB I/O
    return 8192       # 2x 4 MiB double-buffered f32 inputs = 16 MiB I/O


def qfocal_loss(pred, true, *, gamma=1.5, alpha=0.25, reduction="mean",
                max_block_rows=None):
    """Pallas TPU QFocalLoss. pred/true: same shape (e.g. NCHW logits/targets)."""
    assert pred.shape == true.shape
    if reduction not in ("mean", "sum"):
        # TODO(synk): reduction='none' would need an elementwise output slab;
        # the wrapped BCEWithLogitsLoss default reduction is 'mean'.
        raise NotImplementedError("reduction='none' not implemented in this kernel")

    n = pred.size
    flat_p = pred.reshape(-1)   # native dtype, reshape only (no astype copies)
    flat_t = true.reshape(-1)

    # Row alignment scales with sublane packing (f32->8, bf16->16, 8-bit->32 rows).
    packing = max(1, 4 // min(flat_p.dtype.itemsize, flat_t.dtype.itemsize))
    row_align = SUBLANES * packing
    align = row_align * LANES
    n_main = _round_down(n, align)

    total = jnp.float32(0.0)

    if n_main > 0:
        rows = n_main // LANES                       # multiple of row_align
        mbr = max_block_rows if max_block_rows is not None else _pick_max_block_rows()
        block_rows = min(mbr, rows)
        nblocks = pl.cdiv(rows, block_rows)
        masked_grid = (rows % block_rows) != 0       # only last block can be ragged
        chunk_rows = min(CHUNK_ROWS, block_rows)

        p2 = flat_p[:n_main].reshape(rows, LANES)    # pure reshape when aligned
        t2 = flat_t[:n_main].reshape(rows, LANES)

        # Double-buffered input I/O + headroom for per-chunk temporaries.
        io_bytes = 2 * block_rows * LANES * (p2.dtype.itemsize + t2.dtype.itemsize)
        vmem_limit = min(io_bytes + (8 << 20), 48 << 20)

        kernel = functools.partial(
            _qfocal_kernel,
            gamma=float(gamma), alpha=float(alpha),
            block_rows=block_rows, chunk_rows=chunk_rows,
            rows_total=rows, masked_grid=masked_grid)

        partials = pl.pallas_call(
            kernel,
            out_shape=jax.ShapeDtypeStruct((nblocks * SUBLANES, LANES), jnp.float32),
            grid=(nblocks,),
            in_specs=[
                pl.BlockSpec((block_rows, LANES), lambda i: (i, 0)),
                pl.BlockSpec((block_rows, LANES), lambda i: (i, 0)),
            ],
            out_specs=pl.BlockSpec((SUBLANES, LANES), lambda i: (i, 0)),
            compiler_params=pltpu.CompilerParams(
                dimension_semantics=("parallel",),      # megacore sharding on v7x
                vmem_limit_bytes=int(vmem_limit)),
        )(p2, t2)
        total = total + jnp.sum(partials)               # tiny final reduce

    if n_main != n:
        # Unaligned tail (< align elements): plain jnp in the wrapper — avoids
        # the full-tensor jnp.pad copies the previous version did.
        xt = flat_p[n_main:].astype(jnp.float32)
        zt = flat_t[n_main:].astype(jnp.float32)
        e = jnp.exp(-jnp.abs(xt))
        bce = jnp.maximum(xt, 0.0) - xt * zt + jnp.log1p(e)
        p = jax.nn.sigmoid(xt)
        af = zt * alpha + (1.0 - zt) * (1.0 - alpha)
        mf = jnp.power(jnp.abs(zt - p), gamma)
        total = total + jnp.sum(bce * af * mf)

    if reduction == "mean":
        return total / jnp.float32(n)
    return total


def _qfocal_loss_ref(pred, true, gamma=1.5, alpha=0.25, reduction="mean"):
    x = pred.astype(jnp.float32)
    z = true.astype(jnp.float32)
    bce = jnp.maximum(x, 0.0) - x * z + jnp.log1p(jnp.exp(-jnp.abs(x)))
    p = jax.nn.sigmoid(x)
    af = z * alpha + (1.0 - z) * (1.0 - alpha)
    mf = jnp.power(jnp.abs(z - p), gamma)
    loss = bce * af * mf
    return jnp.mean(loss) if reduction == "mean" else jnp.sum(loss)


if __name__ == "__main__":
    key = jax.random.PRNGKey(0)
    ks = jax.random.split(key, 10)

    # Primary case: NCHW logits/targets, exact vreg-tile fit, single block.
    pred = jax.random.normal(ks[0], (2, 4, 16, 16), dtype=jnp.float32) * 2.0
    true = (jax.random.uniform(ks[1], (2, 4, 16, 16)) > 0.7).astype(jnp.float32)
    out = jax.block_until_ready(qfocal_loss(pred, true))
    ref = _qfocal_loss_ref(pred, true)
    assert jnp.allclose(out, ref, rtol=1e-4, atol=1e-6), (out, ref)

    # Multi-block grid with a ragged (masked) LAST block, soft targets, 'sum'.
    pred2 = jax.random.normal(ks[2], (2, 4, 40, 64), dtype=jnp.float32) * 2.0
    true2 = jax.random.uniform(ks[3], (2, 4, 40, 64))
    out2 = jax.block_until_ready(
        qfocal_loss(pred2, true2, reduction="sum", max_block_rows=64))
    ref2 = _qfocal_loss_ref(pred2, true2, reduction="sum")
    assert jnp.allclose(out2, ref2, rtol=1e-4, atol=1e-3), (out2, ref2)

    # Unaligned element count: aligned prefix in-kernel + jnp tail in wrapper.
    pred3 = jax.random.normal(ks[4], (1, 4, 17, 17), dtype=jnp.float32) * 2.0
    true3 = (jax.random.uniform(ks[5], (1, 4, 17, 17)) > 0.5).astype(jnp.float32)
    out3 = jax.block_until_ready(qfocal_loss(pred3, true3))
    ref3 = _qfocal_loss_ref(pred3, true3)
    assert jnp.allclose(out3, ref3, rtol=1e-4, atol=1e-6), (out3, ref3)

    # Exercises the inner fori_loop (2 full chunks) + static remainder chunk.
    pred4 = jax.random.normal(ks[6], (2, 4, 65, 128), dtype=jnp.float32) * 2.0
    true4 = (jax.random.uniform(ks[7], (2, 4, 65, 128)) > 0.7).astype(jnp.float32)
    out4 = jax.block_until_ready(qfocal_loss(pred4, true4, gamma=2.0))
    ref4 = _qfocal_loss_ref(pred4, true4, gamma=2.0)
    assert jnp.allclose(out4, ref4, rtol=1e-4, atol=1e-6), (out4, ref4)

    # bf16 inputs: native-dtype DMA, f32 compute in-kernel.
    pred5 = (jax.random.normal(ks[8], (2, 4, 16, 16)) * 2.0).astype(jnp.bfloat16)
    true5 = (jax.random.uniform(ks[9], (2, 4, 16, 16)) > 0.7).astype(jnp.bfloat16)
    out5 = jax.block_until_ready(qfocal_loss(pred5, true5))
    ref5 = _qfocal_loss_ref(pred5, true5)
    assert jnp.allclose(out5, ref5, rtol=1e-4, atol=1e-6), (out5, ref5)

    print("KERNEL_OK")
</pallas_src>

<mosaic_0001>
module attributes {stable_mosaic.version = 11 : i64} {
  func.func @_qfocal_kernel(%arg0: i32, %arg1: memref<16x128xf32, #tpu.memory_space<vmem>>, %arg2: memref<16x128xf32, #tpu.memory_space<vmem>>, %arg3: memref<8x128xf32, #tpu.memory_space<vmem>>) attributes {dimension_semantics = [#tpu.dimension_semantics<parallel>], iteration_bounds = array<i64: 1>, scalar_prefetch = 0 : i64, scratch_operands = 0 : i64, tpu.core_type = #tpu.core_type<tc>, window_params = [{transform_indices = @transform_0, window_bounds = array<i64: 16, 128>}, {transform_indices = @transform_1, window_bounds = array<i64: 16, 128>}, {transform_indices = @transform_2, window_bounds = array<i64: 8, 128>}]} {
    %c0 = arith.constant 0 : index
    %c0_0 = arith.constant 0 : index
    %0 = vector.load %arg1[%c0, %c0_0] : memref<16x128xf32, #tpu.memory_space<vmem>>, vector<16x128xf32>
    %c0_1 = arith.constant 0 : index
    %c0_2 = arith.constant 0 : index
    %1 = vector.load %arg2[%c0_1, %c0_2] : memref<16x128xf32, #tpu.memory_space<vmem>>, vector<16x128xf32>
    %2 = math.absf %0 : vector<16x128xf32>
    %cst = arith.constant 0.000000e+00 : f32
    %3 = vector.broadcast %cst : f32 to vector<16x128xf32>
    %4 = arith.subf %3, %2 : vector<16x128xf32>
    %5 = math.exp %4 : vector<16x128xf32>
    %cst_3 = arith.constant 0.000000e+00 : f32
    %6 = vector.broadcast %cst_3 : f32 to vector<16x128xf32>
    %7 = arith.maximumf %0, %6 : vector<16x128xf32>
    %8 = arith.mulf %0, %1 : vector<16x128xf32>
    %9 = arith.subf %7, %8 : vector<16x128xf32>
    %10 = math.log1p %5 : vector<16x128xf32>
    %11 = arith.addf %9, %10 : vector<16x128xf32>
    %cst_4 = arith.constant 1.000000e+00 : f32
    %12 = vector.broadcast %cst_4 : f32 to vector<16x128xf32>
    %13 = arith.addf %12, %5 : vector<16x128xf32>
    %14 = tpu.reciprocal %13 {approx = true} : vector<16x128xf32> -> vector<16x128xf32>
    %15 = arith.mulf %13, %14 : vector<16x128xf32>
    %cst_5 = arith.constant 2.000000e+00 : f32
    %16 = vector.broadcast %cst_5 : f32 to vector<16x128xf32>
    %17 = arith.subf %16, %15 : vector<16x128xf32>
    %18 = arith.mulf %14, %17 : vector<16x128xf32>
    %cst_6 = arith.constant 0.000000e+00 : f32
    %19 = vector.broadcast %cst_6 : f32 to vector<16x128xf32>
    %20 = arith.cmpf oge, %0, %19 : vector<16x128xf32>
    %21 = arith.mulf %5, %18 : vector<16x128xf32>
    %22 = arith.select %20, %18, %21 : vector<16x128xi1>, vector<16x128xf32>
    %cst_7 = arith.constant 2.500000e-01 : f32
    %23 = vector.broadcast %cst_7 : f32 to vector<16x128xf32>
    %24 = arith.mulf %1, %23 : vector<16x128xf32>
    %cst_8 = arith.constant 1.000000e+00 : f32
    %25 = vector.broadcast %cst_8 : f32 to vector<16x128xf32>
    %26 = arith.subf %25, %1 : vector<16x128xf32>
    %cst_9 = arith.constant 7.500000e-01 : f32
    %27 = vector.broadcast %cst_9 : f32 to vector<16x128xf32>
    %28 = arith.mulf %26, %27 : vector<16x128xf32>
    %29 = arith.addf %24, %28 : vector<16x128xf32>
    %30 = arith.subf %1, %22 : vector<16x128xf32>
    %31 = math.absf %30 : vector<16x128xf32>
    %32 = math.sqrt %31 : vector<16x128xf32>
    %33 = arith.mulf %31, %32 : vector<16x128xf32>
    %34 = arith.mulf %11, %29 : vector<16x128xf32>
    %35 = arith.mulf %34, %33 : vector<16x128xf32>
    %36 = vector.shape_cast %35 : vector<16x128xf32> to vector<2x8x128xf32>
    %cst_10 = arith.constant dense<0.000000e+00> : vector<8x128xf32>
    %37 = vector.multi_reduction <add>, %36, %cst_10 [0] : vector<2x8x128xf32> to vector<8x128xf32>
    %c0_11 = arith.constant 0 : index
    %c0_12 = arith.constant 0 : index
    %38 = vector.load %arg3[%c0_11, %c0_12] : memref<8x128xf32, #tpu.memory_space<vmem>>, vector<8x128xf32>
    tpu.vector_store %arg3[%c0_11, %c0_12], %37 {strides = array<i32>} : memref<8x128xf32, #tpu.memory_space<vmem>>, vector<8x128xf32>,
    return
  }
  func.func @transform_0(%arg0: i32) -> (i32, i32) {
    %c0_i32 = arith.constant 0 : i32
    %c0_i32_0 = arith.constant 0 : i32
    return %arg0, %c0_i32 : i32, i32
  }
  func.func @transform_1(%arg0: i32) -> (i32, i32) {
    %c0_i32 = arith.constant 0 : i32
    %c0_i32_0 = arith.constant 0 : i32
    return %arg0, %c0_i32 : i32, i32
  }
  func.func @transform_2(%arg0: i32) -> (i32, i32) {
    %c0_i32 = arith.constant 0 : i32
    %c0_i32_0 = arith.constant 0 : i32
    return %arg0, %c0_i32 : i32, i32
  }
}

</mosaic_0001>

<bundles_post_ra>
// kernel: tpu_custom_call.1
= control target key start
LH: loop header
LB: loop body
LE: loop exit
PB: predicated region body
PF: predicated region fallthrough
CT: control target
= control target key end

     0   :  { %7 = vsyncpa [#allocation3], 0  ;;  %s299_s0 = inlined_call_operand.hbm [shape: f32[16,128], index: 0, kind: input, shape index: {}]   ;;  %s300_s1 = inlined_call_operand.hbm [shape: f32[16,128], index: 1, kind: input, shape index: {}]   ;;  %s301_s2 = inlined_call_operand.hbm [shape: f32[8,128], index: 2, kind: output, shape index: {}]  }
   0x1   :  { %8 = vsyncpa [#allocation6], 0 }
   0x2   :  { %9 = vsyncpa [#allocation4], 0  ;;  %s237_s9 = smov [#allocation2]   ;;  %s165_s13 = scalar_lea.hbm %s299_s0, 256 }
   0x3   :  { %s15_s10 = sshll.u32 %s237_s9, 4  ;;  %p166_p0 = scmp.ne.s32.totalorder %s299_s0, %s165_s13  ;;  %s16_s10 = int_to_ptr.vmem [resolvable:$true] %s15_s10 }
   0x4   :  { %p169_p1 = scmp.lt.u32.totalorder %s165_s13, %s299_s0 }
   0x6   :  { %p171_p2 = pnand %p169_p1, %p166_p0 }
   0x8   :  { %174 = shalt.err (!%p171_p2)
}
   0x9   :  { %s175_s18 = scalar_lea.vmem %s16_s10, 256  ;;  %p180_p4 = scmp.lt.s32.totalorder %s16_s10, %s16_s10 }
   0xa   :  { %p176_p3 = scmp.ne.s32.totalorder %s16_s10, %s175_s18  ;;  %p181_p5 = scmp.lt.s32.totalorder %s175_s18, %s175_s18 }
   0xc   :  { %p182_p6 = por %p181_p5, %p180_p4 }
   0xe   :  { %p183_p7 = pnand %p182_p6, %p176_p3 }
  0x10   :  { %186 = shalt.err (!%p183_p7)
}
  0x11   :  { %s238_s19 = smov 128   ;;  %s239_s20 = smov 8  }
  0x12   :  { %21 = dma.hbm_to_vmem [thread:$0]  %s299_s0, 256, %s16_s10, [#allocation3], %s238_s19, %s238_s19, %s239_s20  }
  0x13   :  { %s240_s23 = smov [#allocation5]   ;;  %s187_s27 = scalar_lea.hbm %s300_s1, 256 }
  0x14   :  { %s27_s24 = sshll.u32 %s240_s23, 4  ;;  %p188_p8 = scmp.ne.s32.totalorder %s300_s1, %s187_s27  ;;  %s28_s24 = int_to_ptr.vmem [resolvable:$true] %s27_s24 }
  0x15   :  { %p191_p9 = scmp.lt.u32.totalorder %s187_s27, %s300_s1 }
  0x17   :  { %p193_p10 = pnand %p191_p9, %p188_p8 }
  0x19   :  { %196 = shalt.err (!%p193_p10)
}
  0x1a   :  { %s197_s4 = scalar_lea.vmem %s28_s24, 256  ;;  %p202_p12 = scmp.lt.s32.totalorder %s28_s24, %s28_s24 }
  0x1b   :  { %p198_p11 = scmp.ne.s32.totalorder %s28_s24, %s197_s4  ;;  %p203_p13 = scmp.lt.s32.totalorder %s197_s4, %s197_s4 }
  0x1d   :  { %p204_p0 = por %p203_p13, %p202_p12 }
  0x1f   :  { %p205_p1 = pnand %p204_p0, %p198_p11 }
  0x21   :  { %208 = shalt.err (!%p205_p1)
}
  0x22   :  { %33 = dma.hbm_to_vmem [thread:$0]  %s300_s1, 256, %s28_s24, [#allocation6], %s238_s19, %s238_s19, %s239_s20  }
  0x23   :  { %231 = dma.done.wait [#allocation3], 256  }
  0x24   :  { %232 = vsyncadd [#allocation3], 4294967040 }
  0x25   :  { %233 = dma.done.wait [#allocation6], 256  }
  0x26   :  { %234 = vsyncadd [#allocation6], 4294967040  ;;  %v40_v0 = vld [vmem:[#allocation2] sm:$0xff]  ;;  %v281_v1 = vld [vmem:[#allocation2 + $0x8] sm:$0xff]  ;;  %s241_s1 = smov [#allocation7]  }
  0x27   :  { %v44_v2 = vand.u32 2147483647, %v40_v0  ;;  %v45_v3 = vand.u32 2147483647, %v281_v1  ;;  %vm88_vm0 = vcmp.ge.f32.partialorder %v40_v0, 0.0  ;;  %v42_v20 = vld [vmem:[#allocation5] sm:$0xff] }
  0x28   :  { %vm89_vm1 = vcmp.ge.f32.partialorder %v281_v1, 0.0  ;;  %v43_v22 = vld [vmem:[#allocation5 + $0x8] sm:$0xff]  ;;  %v52_v37 = vmax.f32 %v40_v0, 0.0  ;;  %v53_v39 = vmax.f32 %v281_v1, 0.0  ;;  %v54_v40 = vmul.f32 %v42_v20, %v40_v0  ;;  %s134_s6 = sshll.u32 %s241_s1, 4  ;;  %s135_s6 = int_to_ptr.vmem [resolvable:$true] %s134_s6 }
  0x29   :  { %v46_v4 = vsub.f32 0.0, %v44_v2  ;;  %v47_v5 = vsub.f32 0.0, %v45_v3  ;;  %v96_v41 = vsub.f32 1.0, %v42_v20  ;;  %v55_v42 = vmul.f32 %v43_v22, %v281_v1  ;;  %s209_s7 = scalar_lea.vmem %s135_s6, 128  ;;  %p214_p3 = scmp.lt.s32.totalorder %s135_s6, %s135_s6 }
  0x2a   :  { %v97_v45 = vsub.f32 1.0, %v43_v22  ;;  %v56_v48 = vsub.f32 %v52_v37, %v54_v40  ;;  %v94_v49 = vmul.f32 0.25, %v42_v20  ;;  %v95_v53 = vmul.f32 0.25, %v43_v22  ;;  %p210_p2 = scmp.ne.s32.totalorder %s135_s6, %s209_s7  ;;  %p215_p4 = scmp.lt.s32.totalorder %s209_s7, %s209_s7 }
  0x2b   :  { %v48_v6 = vmul.f32 1.442695, %v46_v4  ;;  %v50_v7 = vmul.f32 1.442695, %v47_v5  ;;  %v98_v50 = vmul.f32 0.75, %v96_v41  ;;  %v57_v51 = vsub.f32 %v53_v39, %v55_v42 }
  0x2c   :  { %v99_v54 = vmul.f32 0.75, %v97_v45  ;;  %p216_p5 = por %p215_p4, %p214_p3 }
  0x2d   :  { %149 = vpow2.f32 %v48_v6  ;;  %v100_v57 = vadd.f32 %v98_v50, %v94_v49 }
  0x2e   :  { %151 = vpow2.f32 %v50_v7  ;;  %v101_v60 = vadd.f32 %v99_v54, %v95_v53  ;;  %p217_p6 = pnand %p216_p5, %p210_p2 }
  0x37   :  { %v150_v8 = vpop.eup %149 }
  0x38   :  { %v152_v9 = vpop.eup %151  ;;  %v58_v10 = vadd.f32 1.0, %v150_v8  ;;  %v61_v23 = vmul.f32 -0.5, %v150_v8  ;;  %v64_v33 = vand.u32 2147483647, %v150_v8 }
  0x39   :  { %v67_v11 = vadd.f32 1.0, %v152_v9  ;;  %v70_v25 = vmul.f32 -0.5, %v152_v9  ;;  %v73_v38 = vand.u32 2147483647, %v152_v9 }
  0x3a   :  { %153 = vrcp.f32 %v58_v10  ;;  %v62_v30 = vadd.f32 1.0, %v61_v23  ;;  %vm65_vm2 = vcmp.lt.f32.partialorder %v64_v33, 0.0004427343 }
  0x3b   :  { %155 = vrcp.f32 %v67_v11  ;;  %v71_v34 = vadd.f32 1.0, %v70_v25  ;;  %vm74_vm3 = vcmp.lt.f32.partialorder %v73_v38, 0.0004427343 }
  0x3c   :  { %157 = vlog2.f32 %v58_v10  ;;  %v63_v44 = vmul.f32 %v150_v8, %v62_v30 }
  0x3d   :  { %159 = vlog2.f32 %v67_v11  ;;  %v72_v47 = vmul.f32 %v152_v9, %v71_v34 }
  0x44   :  { %v154_v12 = vpop.eup %153 }
  0x45   :  { %v156_v13 = vpop.eup %155  ;;  %v82_v14 = vmul.f32 %v154_v12, %v58_v10 }
  0x46   :  { %v83_v15 = vmul.f32 %v156_v13, %v67_v11  ;;  %v158_v32 = vpop.eup %157 }
  0x47   :  { %v84_v16 = vsub.f32 2.0, %v82_v14  ;;  %v160_v36 = vpop.eup %159  ;;  %v60_v43 = vmul.f32 0.6931472, %v158_v32 }
  0x48   :  { %v85_v17 = vsub.f32 2.0, %v83_v15  ;;  %v69_v46 = vmul.f32 0.6931472, %v160_v36 }
  0x49   :  { %v86_v18 = vmul.f32 %v154_v12, %v84_v16  ;;  %v66_v52 = vsel %vm65_vm2, %v63_v44, %v60_v43 }
  0x4a   :  { %v87_v19 = vmul.f32 %v156_v13, %v85_v17  ;;  %v75_v55 = vsel %vm74_vm3, %v72_v47, %v69_v46  ;;  %v76_v56 = vadd.f32 %v66_v52, %v56_v48 }
  0x4b   :  { %v90_v21 = vmul.f32 %v150_v8, %v86_v18  ;;  %v77_v59 = vadd.f32 %v75_v55, %v57_v51 }
  0x4c   :  { %v91_v24 = vmul.f32 %v152_v9, %v87_v19  ;;  %v122_v3 = vmul.f32 %v100_v57, %v76_v56 }
  0x4d   :  { %v92_v26 = vsel %vm88_vm0, %v86_v18, %v90_v21  ;;  %v123_v6 = vmul.f32 %v101_v60, %v77_v59 }
  0x4e   :  { %v93_v27 = vsel %vm89_vm1, %v87_v19, %v91_v24  ;;  %v102_v28 = vsub.f32 %v42_v20, %v92_v26 }
  0x4f   :  { %v103_v29 = vsub.f32 %v43_v22, %v93_v27 }
  0x50   :  { %v104_v31 = vand.u32 2147483647, %v102_v28 }
  0x51   :  { %v105_v35 = vand.u32 2147483647, %v103_v29 }
  0x52   :  { %161 = vrsqrt.f32 %v104_v31  ;;  %vm108_vm4 = vcmp.eq.f32.partialorder %v104_v31, inf  ;;  %v111_v61 = vand.u32 2147483648, %v104_v31  ;;  %vm110_vm5 = vcmp.eq.f32.partialorder %v104_v31, 0.0 }
  0x53   :  { %163 = vrsqrt.f32 %v105_v35  ;;  %vm115_vm6 = vcmp.eq.f32.partialorder %v105_v35, inf  ;;  %v118_v0 = vand.u32 2147483648, %v105_v35  ;;  %vm117_vm7 = vcmp.eq.f32.partialorder %v105_v35, 0.0 }
  0x5c   :  { %v162_v58 = vpop.eup %161 }
  0x5d   :  { %v164_v62 = vpop.eup %163  ;;  %v107_v63 = vmul.f32 %v162_v58, %v104_v31 }
  0x5e   :  { %v114_v1 = vmul.f32 %v164_v62, %v105_v35 }
  0x5f   :  { %v109_v2 = vsel %vm108_vm4, %v104_v31, %v107_v63 }
  0x60   :  { %v112_v4 = vsel %vm110_vm5, %v111_v61, %v109_v2  ;;  %v116_v5 = vsel %vm115_vm6, %v105_v35, %v114_v1 }
  0x61   :  { %v119_v7 = vsel %vm117_vm7, %v118_v0, %v116_v5  ;;  %v120_v8 = vmul.f32 %v112_v4, %v104_v31 }
  0x62   :  { %v121_v9 = vmul.f32 %v119_v7, %v105_v35 }
  0x63   :  { %v124_v10 = vmul.f32 %v122_v3, %v120_v8 }
  0x64   :  { %v125_v11 = vmul.f32 %v123_v6, %v121_v9 }
  0x66   :  { %v126_v12 = vadd.f32 %v125_v11, %v124_v10 }
  0x68   :  { %127 = vst [vmem:[#allocation7] sm:$0xff] %v126_v12 }
  0x69   :  { %220 = shalt.err (!%p217_p6)
}
  0x6a   :  { %s221_s10 = scalar_lea.hbm %s301_s2, 128 }
  0x6b   :  { %p222_p7 = scmp.ne.s32.totalorder %s301_s2, %s221_s10  ;;  %p225_p8 = scmp.lt.u32.totalorder %s221_s10, %s301_s2 }
  0x6d   :  { %p227_p9 = pnand %p225_p8, %p222_p7 }
  0x6f   :  { %230 = shalt.err (!%p227_p9)
}
  0x70   :  { %137 = dma.vmem_to_hbm [thread:$0]  %s135_s6, 128, %s301_s2, [#allocation4]  }
  0x71   :  { %235 = dma.done.wait [#allocation4], 128  }
  0x72   :  { %236 = vsyncadd [#allocation4], 4294967168 }
  0x73   :  { %141 = vsyncpa [#allocation3], 1 }
  0x74   :  { %142 = vsyncpa [#allocation6], 1 }
  0x75   :  { %143 = vsyncpa [#allocation4], 1 }

</bundles_post_ra>
